<compile_context>
chip_gen: v7x
topology: tpu7x:2x2x1
jax: 0.10.0
libtpu: 0.0.40
codegen_flags: <defaults>
</compile_context>

<pallas_src>
import functools

import jax
import jax.numpy as jnp
from jax.experimental import pallas as pl
from jax.experimental.pallas import tpu as pltpu


HIDDEN = 128
IN_DIM = 2
OUT_DIM = 2
OUT_PAD = 128   # lane-dense output width (first OUT_DIM lanes are the real output)


def _softplus(x):
    # Stable softplus; matches torch.nn.functional.softplus to < 3e-9 in f32.
    return jnp.maximum(x, 0.0) + jnp.log1p(jnp.exp(-jnp.abs(x)))


def cond_model_kernel(x_ref, y_ref, emb_ref,
                      w1_ref, b1_ref, w2_ref, b2_ref,
                      w3_ref, b3_ref, w4_ref, b4_ref,
                      o_ref):
    tile_b = x_ref.shape[0]
    n_steps_p = emb_ref.shape[0]

    x = x_ref[...]                               # (tile_b, 2)   f32
    y = y_ref[...]                               # (tile_b, 1)   int32

    # ---- in-kernel embedding gather: one-hot @ concatenated tables -> all three gammas ----
    steps = jax.lax.broadcasted_iota(jnp.int32, (tile_b, n_steps_p), 1)
    onehot = (y == steps).astype(jnp.float32)    # (tile_b, n_steps_p)
    gammas = jnp.dot(onehot, emb_ref[...], preferred_element_type=jnp.float32)  # (tile_b, 3*128)
    g1 = gammas[:, 0 * HIDDEN:1 * HIDDEN]
    g2 = gammas[:, 1 * HIDDEN:2 * HIDDEN]
    g3 = gammas[:, 2 * HIDDEN:3 * HIDDEN]

    # ---- layer 1: ConditionalLinear(2 -> 128); K=2 contraction on the VPU (two FMAs) ----
    w1 = w1_ref[...]                             # (2, 128)
    h = x[:, 0:1] * w1[0:1, :] + x[:, 1:2] * w1[1:2, :] + b1_ref[...]
    h = _softplus(g1 * h)

    # ---- layer 2: ConditionalLinear(128 -> 128) ----
    h = jnp.dot(h, w2_ref[...], preferred_element_type=jnp.float32) + b2_ref[...]
    h = _softplus(g2 * h)

    # ---- layer 3: ConditionalLinear(128 -> 128) ----
    h = jnp.dot(h, w3_ref[...], preferred_element_type=jnp.float32) + b3_ref[...]
    h = _softplus(g3 * h)

    # ---- layer 4: Linear(128 -> 2), zero-padded to 128 lanes for a dense store ----
    out = jnp.dot(h, w4_ref[...], preferred_element_type=jnp.float32) + b4_ref[...]
    o_ref[...] = out.astype(o_ref.dtype)


@functools.partial(jax.jit, static_argnames=("tile_b",))
def conditional_model_forward(x, y, params, tile_b=512):
    """x: (B, 2) float32, y: (B,) int32 in [0, n_steps). Returns (B, 2) float32."""
    B = x.shape[0]
    n_steps = params["embed1"].shape[0]

    # Tile the batch (multiple of 8 sublanes); pad B up so every block is full.
    tile_b = max(8, min(int(tile_b), ((B + 7) // 8) * 8))
    tile_b = ((tile_b + 7) // 8) * 8
    Bp = ((B + tile_b - 1) // tile_b) * tile_b

    xp = x.astype(jnp.float32)
    yp = y.astype(jnp.int32)
    if Bp != B:
        xp = jnp.pad(xp, ((0, Bp - B), (0, 0)))
        yp = jnp.pad(yp, (0, Bp - B))
    yp = yp.reshape(Bp, 1)

    # Lane-concatenate the three embedding tables; pad the step dim to a multiple of 8.
    emb = jnp.concatenate([params["embed1"], params["embed2"], params["embed3"]], axis=1)
    n_steps_p = ((n_steps + 7) // 8) * 8
    if n_steps_p != n_steps:
        emb = jnp.pad(emb, ((0, n_steps_p - n_steps), (0, 0)))

    # Zero-pad the final projection to 128 output lanes (lane-dense out_spec).
    w4p = jnp.pad(params["w4"], ((0, 0), (0, OUT_PAD - OUT_DIM)))
    b4p = jnp.pad(params["b4"], ((0, 0), (0, OUT_PAD - OUT_DIM)))

    grid = (Bp // tile_b,)

    def batch_spec(cols):
        return pl.BlockSpec((tile_b, cols), lambda i: (i, 0))

    def const_spec(shape):
        return pl.BlockSpec(shape, lambda i: (0, 0))

    out = pl.pallas_call(
        cond_model_kernel,
        out_shape=jax.ShapeDtypeStruct((Bp, OUT_PAD), jnp.float32),
        grid=grid,
        in_specs=[
            batch_spec(IN_DIM),                  # x      (streamed per tile)
            batch_spec(1),                       # y      (streamed per tile)
            const_spec(emb.shape),               # embed tables (VMEM-resident)
            const_spec(params["w1"].shape),      # weights/biases (VMEM-resident)
            const_spec(params["b1"].shape),
            const_spec(params["w2"].shape),
            const_spec(params["b2"].shape),
            const_spec(params["w3"].shape),
            const_spec(params["b3"].shape),
            const_spec(w4p.shape),
            const_spec(b4p.shape),
        ],
        out_specs=batch_spec(OUT_PAD),
        compiler_params=pltpu.CompilerParams(
            dimension_semantics=("parallel",)),
    )(xp, yp, emb,
      params["w1"], params["b1"], params["w2"], params["b2"],
      params["w3"], params["b3"], w4p, b4p)

    return out[:B, :OUT_DIM]


def init_params(key, n_steps):
    ks = jax.random.split(key, 11)
    # nn.Linear default init: U(-1/sqrt(fan_in), 1/sqrt(fan_in)); embeddings: U(0, 1).
    def lin(kw, kb, fan_in, fan_out):
        bound = 1.0 / jnp.sqrt(fan_in)
        w = jax.random.uniform(kw, (fan_in, fan_out), jnp.float32, -bound, bound)
        b = jax.random.uniform(kb, (1, fan_out), jnp.float32, -bound, bound)
        return w, b

    w1, b1 = lin(ks[0], ks[1], IN_DIM, HIDDEN)
    w2, b2 = lin(ks[2], ks[3], HIDDEN, HIDDEN)
    w3, b3 = lin(ks[4], ks[5], HIDDEN, HIDDEN)
    w4, b4 = lin(ks[6], ks[7], HIDDEN, OUT_DIM)
    embed1 = jax.random.uniform(ks[8], (n_steps, HIDDEN), jnp.float32)
    embed2 = jax.random.uniform(ks[9], (n_steps, HIDDEN), jnp.float32)
    embed3 = jax.random.uniform(ks[10], (n_steps, HIDDEN), jnp.float32)
    return dict(w1=w1, b1=b1, w2=w2, b2=b2, w3=w3, b3=b3, w4=w4, b4=b4,
                embed1=embed1, embed2=embed2, embed3=embed3)


def reference_forward(x, y, params):
    def softplus(v):  # torch-style thresholded softplus
        return jnp.where(v > 20.0, v, jnp.log1p(jnp.exp(v)))
    h = softplus(params["embed1"][y] * (x @ params["w1"] + params["b1"]))
    h = softplus(params["embed2"][y] * (h @ params["w2"] + params["b2"]))
    h = softplus(params["embed3"][y] * (h @ params["w3"] + params["b3"]))
    return h @ params["w4"] + params["b4"]


if __name__ == "__main__":
    key = jax.random.PRNGKey(0)
    k_param, k_x, k_y = jax.random.split(key, 3)

    n_steps = 10
    B = 8
    params = init_params(k_param, n_steps)
    x = jax.random.normal(k_x, (B, IN_DIM), jnp.float32)
    y = jax.random.randint(k_y, (B,), 0, n_steps, jnp.int32)

    out = conditional_model_forward(x, y, params)
    out = jax.block_until_ready(out)

    ref = reference_forward(x, y, params)
    assert out.shape == (B, OUT_DIM)
    assert jnp.allclose(out, ref, atol=1e-5, rtol=1e-5), "mismatch vs JAX reference"
    print("KERNEL_OK")
</pallas_src>

<mosaic_0001>
module attributes {stable_mosaic.version = 11 : i64} {
  func.func @cond_model_kernel(%arg0: i32, %arg1: memref<8x2xf32, #tpu.memory_space<vmem>>, %arg2: memref<8x1xi32, #tpu.memory_space<vmem>>, %arg3: memref<16x384xf32, #tpu.memory_space<vmem>>, %arg4: memref<2x128xf32, #tpu.memory_space<vmem>>, %arg5: memref<1x128xf32, #tpu.memory_space<vmem>>, %arg6: memref<128x128xf32, #tpu.memory_space<vmem>>, %arg7: memref<1x128xf32, #tpu.memory_space<vmem>>, %arg8: memref<128x128xf32, #tpu.memory_space<vmem>>, %arg9: memref<1x128xf32, #tpu.memory_space<vmem>>, %arg10: memref<128x128xf32, #tpu.memory_space<vmem>>, %arg11: memref<1x128xf32, #tpu.memory_space<vmem>>, %arg12: memref<8x128xf32, #tpu.memory_space<vmem>>) attributes {dimension_semantics = [#tpu.dimension_semantics<parallel>], iteration_bounds = array<i64: 1>, scalar_prefetch = 0 : i64, scratch_operands = 0 : i64, tpu.core_type = #tpu.core_type<tc>, window_params = [{transform_indices = @transform_0, window_bounds = array<i64: 8, 2>}, {transform_indices = @transform_1, window_bounds = array<i64: 8, 1>}, {pipeline_mode = #tpu.pipeline_mode<synchronous>, transform_indices = @transform_2, window_bounds = array<i64: 16, 384>}, {pipeline_mode = #tpu.pipeline_mode<synchronous>, transform_indices = @transform_3, window_bounds = array<i64: 2, 128>}, {pipeline_mode = #tpu.pipeline_mode<synchronous>, transform_indices = @transform_4, window_bounds = array<i64: 1, 128>}, {pipeline_mode = #tpu.pipeline_mode<synchronous>, transform_indices = @transform_5, window_bounds = array<i64: 128, 128>}, {pipeline_mode = #tpu.pipeline_mode<synchronous>, transform_indices = @transform_6, window_bounds = array<i64: 1, 128>}, {pipeline_mode = #tpu.pipeline_mode<synchronous>, transform_indices = @transform_7, window_bounds = array<i64: 128, 128>}, {pipeline_mode = #tpu.pipeline_mode<synchronous>, transform_indices = @transform_8, window_bounds = array<i64: 1, 128>}, {pipeline_mode = #tpu.pipeline_mode<synchronous>, transform_indices = @transform_9, window_bounds = array<i64: 128, 128>}, {pipeline_mode = #tpu.pipeline_mode<synchronous>, transform_indices = @transform_10, window_bounds = array<i64: 1, 128>}, {transform_indices = @transform_11, window_bounds = array<i64: 8, 128>}]} {
    %c0 = arith.constant 0 : index
    %c0_0 = arith.constant 0 : index
    %0 = vector.load %arg1[%c0, %c0_0] : memref<8x2xf32, #tpu.memory_space<vmem>>, vector<8x2xf32>
    %c0_1 = arith.constant 0 : index
    %c0_2 = arith.constant 0 : index
    %1 = vector.load %arg2[%c0_1, %c0_2] : memref<8x1xi32, #tpu.memory_space<vmem>>, vector<8x1xi32>
    %2 = tpu.iota {dimensions = array<i32: 1>} : vector<8x16xi32>
    %3 = vector.broadcast %1 : vector<8x1xi32> to vector<8x16xi32>
    %4 = arith.cmpi eq, %3, %2 : vector<8x16xi32>
    %5 = arith.extui %4 : vector<8x16xi1> to vector<8x16xi32>
    %6 = arith.sitofp %5 : vector<8x16xi32> to vector<8x16xf32>
    %c0_3 = arith.constant 0 : index
    %c0_4 = arith.constant 0 : index
    %7 = vector.load %arg3[%c0_3, %c0_4] : memref<16x384xf32, #tpu.memory_space<vmem>>, vector<16x384xf32>
    %cst = arith.constant dense<0.000000e+00> : vector<8x384xf32>
    %8 = tpu.matmul %6, %7, %cst {dimension_numbers = #tpu.dot_dimension_numbers<[1], [0], [0], [1], [0, 0, 1, 1], [], []>} : vector<8x16xf32>, vector<16x384xf32>, vector<8x384xf32> -> vector<8x384xf32>
    %9 = vector.extract_strided_slice %8 {offsets = [0, 0], sizes = [8, 128], strides = [1, 1]} : vector<8x384xf32> to vector<8x128xf32>
    %10 = vector.extract_strided_slice %8 {offsets = [0, 128], sizes = [8, 128], strides = [1, 1]} : vector<8x384xf32> to vector<8x128xf32>
    %11 = vector.extract_strided_slice %8 {offsets = [0, 256], sizes = [8, 128], strides = [1, 1]} : vector<8x384xf32> to vector<8x128xf32>
    %c0_5 = arith.constant 0 : index
    %c0_6 = arith.constant 0 : index
    %12 = vector.load %arg4[%c0_5, %c0_6] : memref<2x128xf32, #tpu.memory_space<vmem>>, vector<2x128xf32>
    %13 = vector.extract_strided_slice %0 {offsets = [0, 0], sizes = [8, 1], strides = [1, 1]} : vector<8x2xf32> to vector<8x1xf32>
    %14 = vector.extract_strided_slice %12 {offsets = [0, 0], sizes = [1, 128], strides = [1, 1]} : vector<2x128xf32> to vector<1x128xf32>
    %15 = vector.broadcast %13 : vector<8x1xf32> to vector<8x128xf32>
    %16 = vector.broadcast %14 : vector<1x128xf32> to vector<8x128xf32>
    %17 = arith.mulf %15, %16 : vector<8x128xf32>
    %18 = vector.extract_strided_slice %0 {offsets = [0, 1], sizes = [8, 1], strides = [1, 1]} : vector<8x2xf32> to vector<8x1xf32>
    %19 = vector.extract_strided_slice %12 {offsets = [1, 0], sizes = [1, 128], strides = [1, 1]} : vector<2x128xf32> to vector<1x128xf32>
    %20 = vector.broadcast %18 : vector<8x1xf32> to vector<8x128xf32>
    %21 = vector.broadcast %19 : vector<1x128xf32> to vector<8x128xf32>
    %22 = arith.mulf %20, %21 : vector<8x128xf32>
    %23 = arith.addf %17, %22 : vector<8x128xf32>
    %c0_7 = arith.constant 0 : index
    %c0_8 = arith.constant 0 : index
    %24 = vector.load %arg5[%c0_7, %c0_8] : memref<1x128xf32, #tpu.memory_space<vmem>>, vector<1x128xf32>
    %25 = vector.broadcast %24 : vector<1x128xf32> to vector<8x128xf32>
    %26 = arith.addf %23, %25 : vector<8x128xf32>
    %27 = arith.mulf %9, %26 : vector<8x128xf32>
    %cst_9 = arith.constant 0.000000e+00 : f32
    %28 = vector.broadcast %cst_9 : f32 to vector<8x128xf32>
    %29 = arith.maximumf %27, %28 : vector<8x128xf32>
    %30 = math.absf %27 : vector<8x128xf32>
    %cst_10 = arith.constant 0.000000e+00 : f32
    %31 = vector.broadcast %cst_10 : f32 to vector<8x128xf32>
    %32 = arith.subf %31, %30 : vector<8x128xf32>
    %33 = math.exp %32 : vector<8x128xf32>
    %34 = math.log1p %33 : vector<8x128xf32>
    %35 = arith.addf %29, %34 : vector<8x128xf32>
    %c0_11 = arith.constant 0 : index
    %c0_12 = arith.constant 0 : index
    %36 = vector.load %arg6[%c0_11, %c0_12] : memref<128x128xf32, #tpu.memory_space<vmem>>, vector<128x128xf32>
    %cst_13 = arith.constant dense<0.000000e+00> : vector<8x128xf32>
    %37 = tpu.matmul %35, %36, %cst_13 {dimension_numbers = #tpu.dot_dimension_numbers<[1], [0], [0], [1], [0, 0, 1, 1], [], []>} : vector<8x128xf32>, vector<128x128xf32>, vector<8x128xf32> -> vector<8x128xf32>
    %c0_14 = arith.constant 0 : index
    %c0_15 = arith.constant 0 : index
    %38 = vector.load %arg7[%c0_14, %c0_15] : memref<1x128xf32, #tpu.memory_space<vmem>>, vector<1x128xf32>
    %39 = vector.broadcast %38 : vector<1x128xf32> to vector<8x128xf32>
    %40 = arith.addf %37, %39 : vector<8x128xf32>
    %41 = arith.mulf %10, %40 : vector<8x128xf32>
    %cst_16 = arith.constant 0.000000e+00 : f32
    %42 = vector.broadcast %cst_16 : f32 to vector<8x128xf32>
    %43 = arith.maximumf %41, %42 : vector<8x128xf32>
    %44 = math.absf %41 : vector<8x128xf32>
    %cst_17 = arith.constant 0.000000e+00 : f32
    %45 = vector.broadcast %cst_17 : f32 to vector<8x128xf32>
    %46 = arith.subf %45, %44 : vector<8x128xf32>
    %47 = math.exp %46 : vector<8x128xf32>
    %48 = math.log1p %47 : vector<8x128xf32>
    %49 = arith.addf %43, %48 : vector<8x128xf32>
    %c0_18 = arith.constant 0 : index
    %c0_19 = arith.constant 0 : index
    %50 = vector.load %arg8[%c0_18, %c0_19] : memref<128x128xf32, #tpu.memory_space<vmem>>, vector<128x128xf32>
    %cst_20 = arith.constant dense<0.000000e+00> : vector<8x128xf32>
    %51 = tpu.matmul %49, %50, %cst_20 {dimension_numbers = #tpu.dot_dimension_numbers<[1], [0], [0], [1], [0, 0, 1, 1], [], []>} : vector<8x128xf32>, vector<128x128xf32>, vector<8x128xf32> -> vector<8x128xf32>
    %c0_21 = arith.constant 0 : index
    %c0_22 = arith.constant 0 : index
    %52 = vector.load %arg9[%c0_21, %c0_22] : memref<1x128xf32, #tpu.memory_space<vmem>>, vector<1x128xf32>
    %53 = vector.broadcast %52 : vector<1x128xf32> to vector<8x128xf32>
    %54 = arith.addf %51, %53 : vector<8x128xf32>
    %55 = arith.mulf %11, %54 : vector<8x128xf32>
    %cst_23 = arith.constant 0.000000e+00 : f32
    %56 = vector.broadcast %cst_23 : f32 to vector<8x128xf32>
    %57 = arith.maximumf %55, %56 : vector<8x128xf32>
    %58 = math.absf %55 : vector<8x128xf32>
    %cst_24 = arith.constant 0.000000e+00 : f32
    %59 = vector.broadcast %cst_24 : f32 to vector<8x128xf32>
    %60 = arith.subf %59, %58 : vector<8x128xf32>
    %61 = math.exp %60 : vector<8x128xf32>
    %62 = math.log1p %61 : vector<8x128xf32>
    %63 = arith.addf %57, %62 : vector<8x128xf32>
    %c0_25 = arith.constant 0 : index
    %c0_26 = arith.constant 0 : index
    %64 = vector.load %arg10[%c0_25, %c0_26] : memref<128x128xf32, #tpu.memory_space<vmem>>, vector<128x128xf32>
    %cst_27 = arith.constant dense<0.000000e+00> : vector<8x128xf32>
    %65 = tpu.matmul %63, %64, %cst_27 {dimension_numbers = #tpu.dot_dimension_numbers<[1], [0], [0], [1], [0, 0, 1, 1], [], []>} : vector<8x128xf32>, vector<128x128xf32>, vector<8x128xf32> -> vector<8x128xf32>
    %c0_28 = arith.constant 0 : index
    %c0_29 = arith.constant 0 : index
    %66 = vector.load %arg11[%c0_28, %c0_29] : memref<1x128xf32, #tpu.memory_space<vmem>>, vector<1x128xf32>
    %67 = vector.broadcast %66 : vector<1x128xf32> to vector<8x128xf32>
    %68 = arith.addf %65, %67 : vector<8x128xf32>
    %c0_30 = arith.constant 0 : index
    %c0_31 = arith.constant 0 : index
    %69 = vector.load %arg12[%c0_30, %c0_31] : memref<8x128xf32, #tpu.memory_space<vmem>>, vector<8x128xf32>
    tpu.vector_store %arg12[%c0_30, %c0_31], %68 {strides = array<i32>} : memref<8x128xf32, #tpu.memory_space<vmem>>, vector<8x128xf32>,
    return
  }
  func.func @transform_0(%arg0: i32) -> (i32, i32) {
    %c0_i32 = arith.constant 0 : i32
    %c0_i32_0 = arith.constant 0 : i32
    return %arg0, %c0_i32 : i32, i32
  }
  func.func @transform_1(%arg0: i32) -> (i32, i32) {
    %c0_i32 = arith.constant 0 : i32
    %c0_i32_0 = arith.constant 0 : i32
    return %arg0, %c0_i32 : i32, i32
  }
  func.func @transform_2(%arg0: i32) -> (i32, i32) {
    %c0_i32 = arith.constant 0 : i32
    %c0_i32_0 = arith.constant 0 : i32
    %c0_i32_1 = arith.constant 0 : i32
    return %c0_i32, %c0_i32_0 : i32, i32
  }
  func.func @transform_3(%arg0: i32) -> (i32, i32) {
    %c0_i32 = arith.constant 0 : i32
    %c0_i32_0 = arith.constant 0 : i32
    %c0_i32_1 = arith.constant 0 : i32
    return %c0_i32, %c0_i32_0 : i32, i32
  }
  func.func @transform_4(%arg0: i32) -> (i32, i32) {
    %c0_i32 = arith.constant 0 : i32
    %c0_i32_0 = arith.constant 0 : i32
    %c0_i32_1 = arith.constant 0 : i32
    return %c0_i32, %c0_i32_0 : i32, i32
  }
  func.func @transform_5(%arg0: i32) -> (i32, i32) {
    %c0_i32 = arith.constant 0 : i32
    %c0_i32_0 = arith.constant 0 : i32
    %c0_i32_1 = arith.constant 0 : i32
    return %c0_i32, %c0_i32_0 : i32, i32
  }
  func.func @transform_6(%arg0: i32) -> (i32, i32) {
    %c0_i32 = arith.constant 0 : i32
    %c0_i32_0 = arith.constant 0 : i32
    %c0_i32_1 = arith.constant 0 : i32
    return %c0_i32, %c0_i32_0 : i32, i32
  }
  func.func @transform_7(%arg0: i32) -> (i32, i32) {
    %c0_i32 = arith.constant 0 : i32
    %c0_i32_0 = arith.constant 0 : i32
    %c0_i32_1 = arith.constant 0 : i32
    return %c0_i32, %c0_i32_0 : i32, i32
  }
  func.func @transform_8(%arg0: i32) -> (i32, i32) {
    %c0_i32 = arith.constant 0 : i32
    %c0_i32_0 = arith.constant 0 : i32
    %c0_i32_1 = arith.constant 0 : i32
    return %c0_i32, %c0_i32_0 : i32, i32
  }
  func.func @transform_9(%arg0: i32) -> (i32, i32) {
    %c0_i32 = arith.constant 0 : i32
    %c0_i32_0 = arith.constant 0 : i32
    %c0_i32_1 = arith.constant 0 : i32
    return %c0_i32, %c0_i32_0 : i32, i32
  }
  func.func @transform_10(%arg0: i32) -> (i32, i32) {
    %c0_i32 = arith.constant 0 : i32
    %c0_i32_0 = arith.constant 0 : i32
    %c0_i32_1 = arith.constant 0 : i32
    return %c0_i32, %c0_i32_0 : i32, i32
  }
  func.func @transform_11(%arg0: i32) -> (i32, i32) {
    %c0_i32 = arith.constant 0 : i32
    %c0_i32_0 = arith.constant 0 : i32
    return %arg0, %c0_i32 : i32, i32
  }
}

</mosaic_0001>

<bundles_post_ra>
// kernel: conditional_model_forward.1
= control target key start
LH: loop header
LB: loop body
LE: loop exit
PB: predicated region body
PF: predicated region fallthrough
CT: control target
= control target key end

     0   :  { %v832_v0 = vmov 0   ;;  %v833_v2 = vmov 1   ;;  %v834_v10 = vmov 0.0   ;;  %v835_v11 = vmov 0.0|0.0   ;;  %s1124_s1 = inlined_call_operand.vmem [shape: s32[8,1], index: 1, kind: input, shape index: {}]   ;;  %s1125_s0 = inlined_call_operand.vmem [shape: f32[8,2], index: 0, kind: input, shape index: {}]   ;;  %s1126_s2 = inlined_call_operand.vmem [shape: f32[16,384], index: 2, kind: input, shape index: {}]   ;;  %s1127_s5 = inlined_call_operand.vmem [shape: f32[128,128], index: 5, kind: input, shape index: {}]   ;;  %s1128_s3 = inlined_call_operand.vmem [shape: f32[2,128], index: 3, kind: input, shape index: {}]   ;;  %s1129_s4 = inlined_call_operand.vmem [shape: f32[1,128], index: 4, kind: input, shape index: {}]   ;;  %s1130_s7 = inlined_call_operand.vmem [shape: f32[128,128], index: 7, kind: input, shape index: {}]   ;;  %s1131_s6 = inlined_call_operand.vmem [shape: f32[1,128], index: 6, kind: input, shape index: {}]   ;;  %s1132_s9 = inlined_call_operand.vmem [shape: f32[128,128], index: 9, kind: input, shape index: {}]   ;;  %s1133_s8 = inlined_call_operand.vmem [shape: f32[1,128], index: 8, kind: input, shape index: {}]   ;;  %s1134_s10 = inlined_call_operand.vmem [shape: f32[1,128], index: 10, kind: input, shape index: {}]   ;;  %s1135_s11 = inlined_call_operand.vmem [shape: f32[8,128], index: 11, kind: output, shape index: {}]  }
   0x1   :  { %817 = vset.pattern.permute.xlu0 %v832_v0  ;;  %v39_v1 = vld [vmem:[%s1124_s1] sm:$0xff]  ;;  %818 = vset.pattern.permute.xlu1 %v833_v2  ;;  %v49_v4 = vld [vmem:[%s1126_s2 + $0x8] sm:$0xff]  ;;  %v51_v7 = vld [vmem:[%s1126_s2 + $0x18] sm:$0xff]  ;;  %vm836_vm0 = vmmov 0   ;;  %v40_v12 = vlaneseq  ;;  %vm54_vm1 = vcmask 130048  }
   0x2   :  { %v38_v3 = vld [vmem:[%s1125_s0] sm:$0xff]  ;;  %43 = vperm.xlu0 %817, %v39_v1   ;;  %122 = vmatprep.mubr.f32.mxu1 %v834_v10  ;;  %v50_v14 = vld [vmem:[%s1126_s2 + $0x10] sm:$0xff]  ;;  %v53_v15 = vld [vmem:[%s1126_s2 + $0x28] sm:$0xff] }
   0x3   :  { %211 = vperm.xlu1 %818, %v38_v3   ;;  %v52_v5 = vld [vmem:[%s1126_s2 + $0x20] sm:$0xff]  ;;  %740 = vmatprep.subr.bf16.mxu0 %v835_v11  ;;  %v41_v13 = vand.u32 127, %v40_v12  ;;  %v738_v17 = vpack.c.bf16 %v53_v15, %v50_v14  ;;  %v245_v20 = vld [vmem:[%s1127_s5 + $0x8] sm:$0xff]  ;;  %v246_v22 = vld [vmem:[%s1127_s5 + $0x10] sm:$0xff]  ;;  %v206_v43 = vshrl.u32 %v40_v12, 7 }
   0x4   :  { %v48_v6 = vld [vmem:[%s1126_s2] sm:$0xff]  ;;  %v733_v8 = vpack.c.bf16 %v52_v5, %v49_v4  ;;  %660 = vmatprep.mubr.msk.f32.mxu0 %vm836_vm0, %v834_v10  ;;  %v247_v23 = vld [vmem:[%s1127_s5 + $0x18] sm:$0xff]  ;;  %v249_v26 = vld [vmem:[%s1127_s5 + $0x28] sm:$0xff] }
   0x5   :  { %v735_v9 = vpack.c.bf16 %v51_v7, %v48_v6  ;;  %v244_v19 = vld [vmem:[%s1127_s5] sm:$0xff]  ;;  %v744_v24 = vpack.c.bf16 %v247_v23, %v246_v22  ;;  %v250_v28 = vld [vmem:[%s1127_s5 + $0x30] sm:$0xff]  ;;  %v251_v29 = vld [vmem:[%s1127_s5 + $0x38] sm:$0xff]  ;;  %v216_v44 = vsub.s32 1, %v206_v43  ;;  %v207_v45 = vsub.s32 0, %v206_v43 }
   0x6   :  { %734 = vmatprep.subr.bf16.mxu1 %v733_v8  ;;  %202 = vperm.xlu0 %817, %v38_v3   ;;  %v741_v21 = vpack.c.bf16 %v245_v20, %v244_v19  ;;  %v248_v25 = vld [vmem:[%s1127_s5 + $0x20] sm:$0xff]  ;;  %v750_v30 = vpack.c.bf16 %v251_v29, %v250_v28  ;;  %v253_v32 = vld [vmem:[%s1127_s5 + $0x48] sm:$0xff]  ;;  %v254_v34 = vld [vmem:[%s1127_s5 + $0x50] sm:$0xff] }
   0x7   :  { %736 = vmatpush1.bf16.msra.mxu1 %v735_v9  ;;  %v747_v27 = vpack.c.bf16 %v249_v26, %v248_v25  ;;  %v252_v31 = vld [vmem:[%s1127_s5 + $0x40] sm:$0xff]  ;;  %v255_v35 = vld [vmem:[%s1127_s5 + $0x58] sm:$0xff]  ;;  %v257_v38 = vld [vmem:[%s1127_s5 + $0x68] sm:$0xff] }
   0x8   :  { %737 = vmatprep.subr.bf16.mxu1 %v835_v11  ;;  %742 = vmatpush3.bf16.msra.mxu0 %v741_v21  ;;  %v753_v33 = vpack.c.bf16 %v253_v32, %v252_v31  ;;  %v756_v36 = vpack.c.bf16 %v255_v35, %v254_v34  ;;  %v256_v37 = vld [vmem:[%s1127_s5 + $0x60] sm:$0xff]  ;;  %v258_v40 = vld [vmem:[%s1127_s5 + $0x70] sm:$0xff]  ;;  %v259_v41 = vld [vmem:[%s1127_s5 + $0x78] sm:$0xff] }
   0x9   :  { %743 = vmatprep.subr.bf16.mxu0 %v835_v11  ;;  %v759_v39 = vpack.c.bf16 %v257_v38, %v256_v37  ;;  %v762_v42 = vpack.c.bf16 %v259_v41, %v258_v40  ;;  %v199_v46 = vld [vmem:[%s1128_s3] sm:$0x3]  ;;  %v354_v14 = vld [vmem:[%s1130_s7 + $0x8] sm:$0xff]  ;;  %v359_v21 = vld [vmem:[%s1130_s7 + $0x30] sm:$0xff] }
   0xa   :  { %819 = vset.pattern.permute.xlu0 %v833_v2  ;;  %v217_v47 = vrot.slane %v199_v46, %v216_v44  ;;  %v208_v48 = vrot.slane %v199_v46, %v207_v45  ;;  %v563_v54 = vld [vmem:[%s1129_s4] ss:$0 sm:$0xff]  ;;  %v358_v19 = vld [vmem:[%s1130_s7 + $0x28] sm:$0xff]  ;;  %v360_v22 = vld [vmem:[%s1130_s7 + $0x38] sm:$0xff] }
   0xb   :  { %v774_v23 = vpack.c.bf16 %v360_v22, %v359_v21  ;;  %v362_v25 = vld [vmem:[%s1130_s7 + $0x48] sm:$0xff]  ;;  %v364_v28 = vld [vmem:[%s1130_s7 + $0x58] sm:$0xff] }
   0xc   :  { %745 = vmatpush3.bf16.msra.mxu0 %v744_v24  ;;  %v361_v24 = vld [vmem:[%s1130_s7 + $0x40] sm:$0xff]  ;;  %v366_v31 = vld [vmem:[%s1130_s7 + $0x68] sm:$0xff]  ;;  %v368_v34 = vld [vmem:[%s1130_s7 + $0x78] sm:$0xff] }
   0xd   :  { %746 = vmatprep.subr.bf16.mxu0 %v835_v11  ;;  %v777_v26 = vpack.c.bf16 %v362_v25, %v361_v24 }
  0x10   :  { %748 = vmatpush3.bf16.msra.mxu0 %v747_v27  ;;  %v363_v27 = vld [vmem:[%s1130_s7 + $0x50] sm:$0xff] }
  0x11   :  { %749 = vmatprep.subr.bf16.mxu0 %v835_v11  ;;  %v780_v29 = vpack.c.bf16 %v364_v28, %v363_v27 }
  0x14   :  { %751 = vmatpush3.bf16.msra.mxu0 %v750_v30  ;;  %v365_v30 = vld [vmem:[%s1130_s7 + $0x60] sm:$0xff] }
  0x15   :  { %752 = vmatprep.subr.bf16.mxu0 %v835_v11  ;;  %v783_v32 = vpack.c.bf16 %v366_v31, %v365_v30 }
  0x18   :  { %754 = vmatpush3.bf16.msra.mxu0 %v753_v33  ;;  %v367_v33 = vld [vmem:[%s1130_s7 + $0x70] sm:$0xff] }
  0x19   :  { %755 = vmatprep.subr.bf16.mxu0 %v835_v11  ;;  %v786_v35 = vpack.c.bf16 %v368_v34, %v367_v33 }
  0x1c   :  { %757 = vmatpush3.bf16.msra.mxu0 %v756_v36  ;;  %v564_v36 = vld [vmem:[%s1131_s6] ss:$0 sm:$0xff] }
  0x1d   :  { %758 = vmatprep.subr.bf16.mxu0 %v835_v11 }
  0x20   :  { %760 = vmatpush3.bf16.msra.mxu0 %v759_v39 }
  0x21   :  { %761 = vmatprep.subr.bf16.mxu0 %v835_v11 }
  0x24   :  { %763 = vmatpush3.bf16.msra.mxu0 %v762_v42 }
  0x25   :  { %788 = vmatprep.subr.bf16.mxu0 %v835_v11 }
  0x81   :  { %v44_v16 = vpop.permute.xlu0 %43 }
  0x82   :  { %vm45_vm2 = vcmp.eq.s32.totalorder %v44_v16, %v41_v13  ;;  %v212_v49 = vpop.permute.xlu1 %211  ;;  %v353_v13 = vld [vmem:[%s1130_s7] sm:$0xff]  ;;  %v355_v16 = vld [vmem:[%s1130_s7 + $0x10] sm:$0xff] }
  0x83   :  { %v560_v18 = vsel %vm45_vm2, 1.0, %v834_v10  ;;  %v218_v51 = vmul.f32 %v217_v47, %v212_v49  ;;  %v765_v15 = vpack.c.bf16 %v354_v14, %v353_v13  ;;  %v475_v13 = vld [vmem:[%s1132_s9 + $0x68] sm:$0xff] }
  0x84   :  { %561 = vmatmul.mubr.msk.f32.vlgmr.msra.gmra.mrb[0].mxu1 %vm54_vm1, %v560_v18 }
  0x85   :  { %739 = vmatpush3.bf16.msra.mxu1 %v738_v17  ;;  %625 = vmatprep.mubr.msk.f32.mxu1 %vm836_vm0, %v834_v10  ;;  %v203_v50 = vpop.permute.xlu0 %202 }
  0x86   :  { %764 = vmatprep.subr.bf16.mxu1 %v835_v11  ;;  %v209_v52 = vmul.f32 %v208_v48, %v203_v50 }
  0x88   :  { %626 = vmatmul.mubr.msk.f32.vlgmr.msra.gmra.mrb[2].mxu1 %vm54_vm1, %v560_v18  ;;  %v219_v53 = vadd.f32 %v218_v51, %v209_v52  ;;  %v357_v18 = vld [vmem:[%s1130_s7 + $0x20] sm:$0xff] }
  0x89   :  { %695 = vmatprep.mubr.msk.f32.mxu1 %vm836_vm0, %v834_v10  ;;  %766 = vmatpush3.bf16.msra.mxu1 %v765_v15  ;;  %v771_v20 = vpack.c.bf16 %v358_v19, %v357_v18  ;;  %v476_v15 = vld [vmem:[%s1132_s9 + $0x70] sm:$0xff] }
  0x8a   :  { %v227_v55 = vadd.f32 %v563_v54, %v219_v53  ;;  %767 = vmatprep.subr.bf16.mxu1 %v835_v11 }
 0x157   :  { %v124_v56 = vpop.f32.mrb[0].mxu1 }
 0x158   :  { %v228_v57 = vmul.f32 %v227_v55, %v124_v56  ;;  %v994_v58 = vpop.f32.mrb[1].mxu1  ;;  %v462_v55 = vld [vmem:[%s1132_s9] sm:$0xff]  ;;  %v463_v56 = vld [vmem:[%s1132_s9 + $0x8] sm:$0xff] }
 0x15a   :  { %v230_v59 = vand.u32 2147483647, %v228_v57  ;;  %v229_v8 = vmax.f32 %v228_v57, 0.0  ;;  %v789_v57 = vpack.c.bf16 %v463_v56, %v462_v55 }
 0x15b   :  { %v996_v60 = vpop.f32.mrb[2].mxu1 }
 0x15c   :  { %v231_v61 = vsub.f32 0.0, %v230_v59  ;;  %v627_v62 = vpop.f32.mrb[3].mxu1  ;;  %v465_v59 = vld [vmem:[%s1132_s9 + $0x18] sm:$0xff] }
 0x15d   :  { %v466_v62 = vld [vmem:[%s1132_s9 + $0x20] sm:$0xff] }
 0x15e   :  { %v232_v63 = vmul.f32 1.442695, %v231_v61 }
 0x160   :  { %820 = vpow2.f32 %v232_v63  ;;  %v467_v63 = vld [vmem:[%s1132_s9 + $0x28] sm:$0xff] }
 0x16a   :  { %v821_v0 = vpop.eup %820 }
 0x16b   :  { %v234_v1 = vadd.f32 1.0, %v821_v0  ;;  %v237_v2 = vmul.f32 -0.5, %v821_v0  ;;  %v240_v4 = vand.u32 2147483647, %v821_v0 }
 0x16d   :  { %822 = vlog2.f32 %v234_v1  ;;  %v238_v3 = vadd.f32 1.0, %v237_v2  ;;  %vm241_vm3 = vcmp.lt.f32.partialorder %v240_v4, 0.0004427343  ;;  %v468_v1 = vld [vmem:[%s1132_s9 + $0x30] sm:$0xff]  ;;  %v469_v2 = vld [vmem:[%s1132_s9 + $0x38] sm:$0xff]  ;;  %v470_v4 = vld [vmem:[%s1132_s9 + $0x40] sm:$0xff] }
 0x16f   :  { %v239_v7 = vmul.f32 %v821_v0, %v238_v3  ;;  %v795_v0 = vpack.c.bf16 %v467_v63, %v466_v62  ;;  %v798_v3 = vpack.c.bf16 %v469_v2, %v468_v1 }
 0x177   :  { %v823_v5 = vpop.eup %822 }
 0x178   :  { %v236_v6 = vmul.f32 0.6931472, %v823_v5  ;;  %v471_v5 = vld [vmem:[%s1132_s9 + $0x48] sm:$0xff] }
 0x17a   :  { %v242_v9 = vsel %vm241_vm3, %v239_v7, %v236_v6  ;;  %v801_v6 = vpack.c.bf16 %v471_v5, %v470_v4  ;;  %v472_v7 = vld [vmem:[%s1132_s9 + $0x50] sm:$0xff] }
 0x17b   :  { %v243_v12 = vadd.f32 %v242_v9, %v229_v8  ;;  %v473_v8 = vld [vmem:[%s1132_s9 + $0x58] sm:$0xff] }
 0x17c   :  { %v804_v9 = vpack.c.bf16 %v473_v8, %v472_v7 }
 0x17d   :  { %661 = vmatmul.mubr.f32.vlgmr.msra.gmra.mrb[0].mxu0 %v243_v12  ;;  %v474_v12 = vld [vmem:[%s1132_s9 + $0x60] sm:$0xff] }
 0x17e   :  { %730 = vmatprep.mubr.msk.f32.mxu0 %vm836_vm0, %v834_v10  ;;  %v356_v10 = vld [vmem:[%s1130_s7 + $0x18] sm:$0xff]  ;;  %790 = vmatpush3.bf16.msra.mxu0 %v789_v57  ;;  %v807_v14 = vpack.c.bf16 %v475_v13, %v474_v12 }
 0x17f   :  { %v768_v17 = vpack.c.bf16 %v356_v10, %v355_v16  ;;  %791 = vmatprep.subr.bf16.mxu0 %v835_v11  ;;  %v477_v16 = vld [vmem:[%s1132_s9 + $0x78] sm:$0xff] }
 0x180   :  { %v810_v10 = vpack.c.bf16 %v477_v16, %v476_v15 }
 0x181   :  { %769 = vmatpush3.bf16.msra.mxu1 %v768_v17  ;;  %v565_v17 = vld [vmem:[%s1133_s8] ss:$0 sm:$0xff] }
 0x182   :  { %770 = vmatprep.subr.bf16.mxu1 %v835_v11 }
 0x185   :  { %772 = vmatpush3.bf16.msra.mxu1 %v771_v20 }
 0x186   :  { %773 = vmatprep.subr.bf16.mxu1 %v835_v11 }
 0x189   :  { %775 = vmatpush3.bf16.msra.mxu1 %v774_v23 }
 0x18a   :  { %776 = vmatprep.subr.bf16.mxu1 %v835_v11 }
 0x18d   :  { %778 = vmatpush3.bf16.msra.mxu1 %v777_v26 }
 0x18e   :  { %779 = vmatprep.subr.bf16.mxu1 %v835_v11 }
 0x191   :  { %781 = vmatpush3.bf16.msra.mxu1 %v780_v29 }
 0x192   :  { %782 = vmatprep.subr.bf16.mxu1 %v835_v11 }
 0x195   :  { %784 = vmatpush3.bf16.msra.mxu1 %v783_v32 }
 0x196   :  { %785 = vmatprep.subr.bf16.mxu1 %v835_v11 }
 0x199   :  { %787 = vmatpush3.bf16.msra.mxu1 %v786_v35 }
 0x250   :  { %v333_v37 = vpop.f32.mrb[0].mxu0 }
 0x251   :  { %v334_v38 = vadd.f32 %v564_v36, %v333_v37  ;;  %v662_v39 = vpop.f32.mrb[1].mxu0 }
 0x253   :  { %v337_v40 = vmul.f32 %v334_v38, %v994_v58  ;;  %v464_v58 = vld [vmem:[%s1132_s9 + $0x10] sm:$0xff] }
 0x254   :  { %v792_v61 = vpack.c.bf16 %v465_v59, %v464_v58 }
 0x255   :  { %v339_v41 = vand.u32 2147483647, %v337_v40  ;;  %v338_v52 = vmax.f32 %v337_v40, 0.0 }
 0x256   :  { %793 = vmatpush3.bf16.msra.mxu0 %v792_v61 }
 0x257   :  { %v340_v42 = vsub.f32 0.0, %v339_v41  ;;  %794 = vmatprep.subr.bf16.mxu0 %v835_v11 }
 0x259   :  { %v341_v43 = vmul.f32 1.442695, %v340_v42 }
 0x25a   :  { %796 = vmatpush3.bf16.msra.mxu0 %v795_v0 }
 0x25b   :  { %824 = vpow2.f32 %v341_v43  ;;  %797 = vmatprep.subr.bf16.mxu0 %v835_v11 }
 0x25e   :  { %799 = vmatpush3.bf16.msra.mxu0 %v798_v3 }
 0x25f   :  { %800 = vmatprep.subr.bf16.mxu0 %v835_v11 }
 0x262   :  { %802 = vmatpush3.bf16.msra.mxu0 %v801_v6 }
 0x263   :  { %803 = vmatprep.subr.bf16.mxu0 %v835_v11 }
 0x265   :  { %v825_v44 = vpop.eup %824 }
 0x266   :  { %v343_v45 = vadd.f32 1.0, %v825_v44  ;;  %v346_v46 = vmul.f32 -0.5, %v825_v44  ;;  %v349_v48 = vand.u32 2147483647, %v825_v44  ;;  %805 = vmatpush3.bf16.msra.mxu0 %v804_v9 }
 0x267   :  { %806 = vmatprep.subr.bf16.mxu0 %v835_v11 }
 0x268   :  { %826 = vlog2.f32 %v343_v45  ;;  %v347_v47 = vadd.f32 1.0, %v346_v46  ;;  %vm350_vm4 = vcmp.lt.f32.partialorder %v349_v48, 0.0004427343 }
 0x26a   :  { %v348_v51 = vmul.f32 %v825_v44, %v347_v47  ;;  %808 = vmatpush3.bf16.msra.mxu0 %v807_v14 }
 0x26b   :  { %809 = vmatprep.subr.bf16.mxu0 %v835_v11 }
 0x26e   :  { %811 = vmatpush3.bf16.msra.mxu0 %v810_v10 }
 0x272   :  { %v827_v49 = vpop.eup %826 }
 0x273   :  { %v345_v50 = vmul.f32 0.6931472, %v827_v49 }
 0x275   :  { %v351_v53 = vsel %vm350_vm4, %v348_v51, %v345_v50 }
 0x276   :  { %v352_v54 = vadd.f32 %v351_v53, %v338_v52 }
 0x278   :  { %696 = vmatmul.mubr.f32.vlgmr.msra.gmra.mrb[4].mxu1 %v352_v54 }
 0x34b   :  { %v442_v18 = vpop.f32.mrb[4].mxu1 }
 0x34c   :  { %v443_v19 = vadd.f32 %v565_v17, %v442_v18  ;;  %v697_v20 = vpop.f32.mrb[5].mxu1 }
 0x34e   :  { %v446_v21 = vmul.f32 %v443_v19, %v996_v60  ;;  %v566_v60 = vld [vmem:[%s1134_s10] ss:$0 sm:$0xff] }
 0x350   :  { %v448_v11 = vand.u32 2147483647, %v446_v21  ;;  %v447_v32 = vmax.f32 %v446_v21, 0.0 }
 0x352   :  { %v449_v22 = vsub.f32 0.0, %v448_v11 }
 0x354   :  { %v450_v23 = vmul.f32 1.442695, %v449_v22 }
 0x356   :  { %828 = vpow2.f32 %v450_v23 }
 0x360   :  { %v829_v24 = vpop.eup %828 }
 0x361   :  { %v452_v25 = vadd.f32 1.0, %v829_v24  ;;  %v455_v26 = vmul.f32 -0.5, %v829_v24  ;;  %v458_v28 = vand.u32 2147483647, %v829_v24 }
 0x363   :  { %830 = vlog2.f32 %v452_v25  ;;  %v456_v27 = vadd.f32 1.0, %v455_v26  ;;  %vm459_vm5 = vcmp.lt.f32.partialorder %v458_v28, 0.0004427343 }
 0x365   :  { %v457_v31 = vmul.f32 %v829_v24, %v456_v27 }
 0x36d   :  { %v831_v29 = vpop.eup %830 }
 0x36e   :  { %v454_v30 = vmul.f32 0.6931472, %v831_v29 }
 0x370   :  { %v460_v33 = vsel %vm459_vm5, %v457_v31, %v454_v30 }
 0x371   :  { %v461_v34 = vadd.f32 %v460_v33, %v447_v32 }
 0x373   :  { %731 = vmatmul.mubr.f32.vlgmr.msra.gmra.mrb[2].mxu0 %v461_v34 }
 0x446   :  { %v551_v35 = vpop.f32.mrb[2].mxu0 }
 0x447   :  { %v552_v36 = vadd.f32 %v566_v60, %v551_v35  ;;  %v732_v37 = vpop.f32.mrb[3].mxu0 }
 0x449   :  { %555 = vst [vmem:[%s1135_s11] sm:$0xff] %v552_v36 }

</bundles_post_ra>
